<compile_context>
chip_gen: v6e
topology: v6e:2x2x1
jax: 0.10.0
libtpu: 0.0.40
codegen_flags: <defaults>
</compile_context>

<pallas_src>
import functools
import math

import jax
import jax.numpy as jnp
from jax.experimental import pallas as pl
from jax.experimental.pallas import tpu as pltpu


def _round_up(x, m):
    return ((x + m - 1) // m) * m


def _vmem_budget_bytes():
    """Generation-aware scoped-VMEM budget (~80% of physical VMEM)."""
    try:
        cap = int(pltpu.get_tpu_info().vmem_capacity_bytes)
    except Exception:
        cap = 64 * 1024 * 1024          # assume the smallest (v7x) if query fails
    return int(cap * 0.8)               # ~102 MiB on v5e/v6e, ~51 MiB on v7x


# ----------------------------- Pallas kernel --------------------------------
def _fused_mlp_kernel(*refs, num_layers):
    # refs = (x_ref, w0, b0, w1, b1, ..., w_{L-1}, b_{L-1}, o_ref)
    x_ref = refs[0]
    o_ref = refs[-1]
    wb = refs[1:-1]

    x = x_ref[...].astype(jnp.float32)                    # (TILE_M, K0_pad)
    for li in range(num_layers):
        w = wb[2 * li][...]                               # (K_pad, N_pad) bf16, resident
        b = wb[2 * li + 1][...]                           # (1, N_pad)  f32,  resident
        # bf16 x bf16 -> f32 accumulate: MXU peak rate on all generations.
        y = jnp.dot(x.astype(jnp.bfloat16), w,
                    preferred_element_type=jnp.float32)
        y = y + b                                          # bias in f32 (VPU)
        if li != num_layers - 1:
            y = jnp.maximum(y, 0.0)                        # ReLU in f32 (VPU)
        x = y                                              # stays in vregs/VMEM
    o_ref[...] = x.astype(o_ref.dtype)


# ----------------------------- wrapper ---------------------------------------
def fused_mlp(x2d, weights, biases, true_out_dim, *, max_tile_m=1024):
    """Single fused pallas_call computing Linear+ReLU ... Linear on (M, K) rows.

    weights[i]: (Kin_pad, Nout_pad) bf16, zero-padded outside the true dims.
    biases[i] : (1, Nout_pad) f32, zero-padded.
    """
    M, K = x2d.shape
    num_layers = len(weights)
    K0_pad = weights[0].shape[0]
    N_last_pad = weights[-1].shape[1]

    # ---- VMEM accounting (actual dtypes / buffer counts) ---------------------
    w_bytes = sum(int(w.size) * w.dtype.itemsize for w in weights)
    b_bytes = sum(int(b.size) * b.dtype.itemsize for b in biases)
    resident_1buf = w_bytes + b_bytes          # weights/biases single-buffered

    # Per-row activation footprint: double-buffered f32 in/out tiles plus an
    # f32 intermediate and a bf16 matmul operand per layer.
    act_bytes_per_row = 4 * (2 * K0_pad + 2 * N_last_pad)
    for w in weights:
        act_bytes_per_row += 6 * w.shape[1]

    vmem_budget = _vmem_budget_bytes()
    slack = 2 << 20
    if resident_1buf + 8 * act_bytes_per_row + slack > vmem_budget:
        # TODO(synk): stream oversized layer weights over a K/N grid axis
        # (pltpu.emit_pipeline) instead of whole-array residency.
        raise NotImplementedError(
            "resident-weight fused MLP does not fit in VMEM on this TPU; "
            "weight-streaming path not implemented")

    tile_cap = (vmem_budget - resident_1buf - slack) // act_bytes_per_row
    tile_cap = max(8, min((int(tile_cap) // 8) * 8, max_tile_m))

    # ---- row tiling -----------------------------------------------------------
    M_min = _round_up(max(M, 1), 8)
    if M_min <= 8:
        num_tiles = 1                      # can't split a single sublane tile
    else:
        # >=2 grid steps so the "parallel" axis shards over v7x's 2 TensorCores.
        num_tiles = max(2, pl.cdiv(M_min, tile_cap))
    tile_m = _round_up(pl.cdiv(M_min, num_tiles), 8)
    M_pad = tile_m * num_tiles
    assert M_pad >= M
    grid = (num_tiles,)

    # ---- input padding (skipped when already lane/row aligned) ---------------
    if M_pad == M and K == K0_pad:
        x_in = x2d
    else:
        x_in = jnp.pad(x2d, ((0, M_pad - M), (0, K0_pad - K)))

    flat_wb = []
    for w, b in zip(weights, biases):
        flat_wb += [w, b]

    # Advisory cost estimate for XLA's scheduler.
    flops = sum(2 * M_pad * w.shape[0] * w.shape[1] for w in weights)
    bytes_accessed = (int(x_in.size) * x_in.dtype.itemsize
                      + M_pad * N_last_pad * 4 + w_bytes + b_bytes)
    cost = pl.CostEstimate(flops=flops, transcendentals=0,
                           bytes_accessed=bytes_accessed)

    kernel = functools.partial(_fused_mlp_kernel, num_layers=num_layers)

    def build(use_buffered):
        if use_buffered:
            wb_kwargs = dict(pipeline_mode=pl.Buffered(buffer_count=1))
            wb_buf = 1
        else:
            wb_kwargs = {}
            wb_buf = 2
        in_specs = [pl.BlockSpec((tile_m, K0_pad), lambda i: (i, 0))]
        for w, b in zip(weights, biases):
            # Whole-array blocks, same block every grid step -> resident weights.
            in_specs.append(pl.BlockSpec(w.shape, lambda i: (0, 0), **wb_kwargs))
            in_specs.append(pl.BlockSpec(b.shape, lambda i: (0, 0), **wb_kwargs))
        out_spec = pl.BlockSpec((tile_m, N_last_pad), lambda i: (i, 0))

        vmem_needed = wb_buf * (w_bytes + b_bytes) + act_bytes_per_row * tile_m
        vmem_limit = int(min(vmem_budget,
                             max(vmem_needed + vmem_needed // 4 + slack,
                                 32 << 20)))

        return pl.pallas_call(
            kernel,
            out_shape=jax.ShapeDtypeStruct((M_pad, N_last_pad), x2d.dtype),
            grid=grid,
            in_specs=in_specs,
            out_specs=out_spec,
            compiler_params=pltpu.CompilerParams(
                # Row tiles are independent -> megacore sharding on v7x,
                # harmless no-op on single-TC v5e/v6e.
                dimension_semantics=("parallel",),
                vmem_limit_bytes=vmem_limit,
            ),
            cost_estimate=cost,
        )

    try:
        use_buffered = hasattr(pl, "Buffered")
        out_pad = build(use_buffered)(x_in, *flat_wb)
    except Exception:
        if not use_buffered:
            raise
        # Fallback: single-buffered pipeline_mode unsupported on this jax
        # version -> plain (double-buffered) resident specs.
        out_pad = build(False)(x_in, *flat_wb)

    return out_pad[:M, :true_out_dim]


# ----------------------------- MLP params / forward --------------------------
def init_mlp_params(key, inp_dim, oup_dim, mid_channels, num_layers):
    """Mimics nn.Linear default init (uniform +-1/sqrt(fan_in)).

    Weights are stored as (in, out) (PyTorch stores (out, in)), zero-padded to
    128-multiples on both feature axes so the kernel is lane-dense, and cast to
    bf16 (MXU peak dtype; accumulation stays f32 inside the kernel).  Biases
    stay f32 so the bias add / ReLU run in f32 on every generation.
    """
    # TODO(synk): on v7x, pad feature dims >128 to multiples of 256 to fill the
    # 2x256^2 MXU; irrelevant at these widths.
    dims = [inp_dim] + [mid_channels] * (num_layers - 1) + [oup_dim]
    weights, biases = [], []
    for i in range(num_layers):
        fan_in, fan_out = dims[i], dims[i + 1]
        kin_pad = _round_up(fan_in, 128)
        kout_pad = _round_up(fan_out, 128)
        key, kw, kb = jax.random.split(key, 3)
        bound = 1.0 / math.sqrt(fan_in)
        w = jax.random.uniform(kw, (fan_in, fan_out), jnp.float32, -bound, bound)
        b = jax.random.uniform(kb, (fan_out,), jnp.float32, -bound, bound)
        w_pad = jnp.zeros((kin_pad, kout_pad), jnp.float32).at[:fan_in, :fan_out].set(w)
        b_pad = jnp.zeros((1, kout_pad), jnp.float32).at[0, :fan_out].set(b)
        weights.append(w_pad.astype(jnp.bfloat16))
        biases.append(b_pad)
    return {"weights": weights, "biases": biases, "dims": dims}


def mlp_forward(params, q):
    """Matches MLP.forward / fc.forward semantics (batchnorm=False)."""
    orig_ndim = q.ndim
    if orig_ndim == 3:
        B = q.shape[0]
        x = q.reshape(q.shape[0] * q.shape[1], -1)
    else:
        x = q
    out = fused_mlp(x, params["weights"], params["biases"],
                    true_out_dim=params["dims"][-1])
    if orig_ndim == 3:
        out = out.reshape(B, -1, out.shape[-1])
    return out
    # TODO(synk): batchnorm=True path (nn.BatchNorm1d, training-mode batch stats)
    # not implemented; default MLP(batchnorm=False) never builds it.


# ----------------------------- main ------------------------------------------
if __name__ == "__main__":
    key = jax.random.PRNGKey(0)
    kparam, kin3, kin2 = jax.random.split(key, 3)

    inp_dim, oup_dim, mid_channels, num_layers = 32, 16, 64, 3
    params = init_mlp_params(kparam, inp_dim, oup_dim, mid_channels, num_layers)

    def ref(params, x2d):
        # Pure-JAX reference mimicking the kernel's bf16-operand / f32-accumulate
        # matmuls (bf16 products are exact in f32).
        dims = params["dims"]
        n = len(params["weights"])
        x = x2d
        for li in range(n):
            fi, fo = dims[li], dims[li + 1]
            w = params["weights"][li][:fi, :fo].astype(jnp.float32)
            b = params["biases"][li][0, :fo]
            x = x.astype(jnp.bfloat16).astype(jnp.float32) @ w + b
            if li != n - 1:
                x = jnp.maximum(x, 0.0)
        return x

    # 3D input (B, T, inp_dim) — exercises the flatten/unflatten path of fc.forward
    # and a >=2-step grid (megacore-friendly).
    q3 = jax.random.normal(kin3, (2, 8, inp_dim), dtype=jnp.float32)
    out3 = jax.block_until_ready(mlp_forward(params, q3))
    assert out3.shape == (2, 8, oup_dim), out3.shape
    ref3 = ref(params, q3.reshape(-1, inp_dim)).reshape(2, -1, oup_dim)
    assert jnp.allclose(out3, ref3, atol=2e-2, rtol=2e-2)

    # 2D input path (rows not a multiple of 8 — exercises row padding).
    q2 = jax.random.normal(kin2, (5, inp_dim), dtype=jnp.float32)
    out2 = jax.block_until_ready(mlp_forward(params, q2))
    assert out2.shape == (5, oup_dim), out2.shape
    assert jnp.allclose(out2, ref(params, q2), atol=2e-2, rtol=2e-2)

    print("KERNEL_OK")
</pallas_src>

<mosaic_0001>
module attributes {stable_mosaic.version = 11 : i64} {
  func.func @_fused_mlp_kernel(%arg0: i32, %arg1: memref<8x128xf32, #tpu.memory_space<vmem>>, %arg2: memref<128x128xbf16, #tpu.memory_space<vmem>>, %arg3: memref<1x128xf32, #tpu.memory_space<vmem>>, %arg4: memref<128x128xbf16, #tpu.memory_space<vmem>>, %arg5: memref<1x128xf32, #tpu.memory_space<vmem>>, %arg6: memref<128x128xbf16, #tpu.memory_space<vmem>>, %arg7: memref<1x128xf32, #tpu.memory_space<vmem>>, %arg8: memref<8x128xf32, #tpu.memory_space<vmem>>) attributes {dimension_semantics = [#tpu.dimension_semantics<parallel>], iteration_bounds = array<i64: 2>, scalar_prefetch = 0 : i64, scratch_operands = 0 : i64, tpu.core_type = #tpu.core_type<tc>, window_params = [{transform_indices = @transform_0, window_bounds = array<i64: 8, 128>}, {pipeline_mode = #tpu.pipeline_mode<synchronous>, transform_indices = @transform_1, window_bounds = array<i64: 128, 128>}, {pipeline_mode = #tpu.pipeline_mode<synchronous>, transform_indices = @transform_2, window_bounds = array<i64: 1, 128>}, {pipeline_mode = #tpu.pipeline_mode<synchronous>, transform_indices = @transform_3, window_bounds = array<i64: 128, 128>}, {pipeline_mode = #tpu.pipeline_mode<synchronous>, transform_indices = @transform_4, window_bounds = array<i64: 1, 128>}, {pipeline_mode = #tpu.pipeline_mode<synchronous>, transform_indices = @transform_5, window_bounds = array<i64: 128, 128>}, {pipeline_mode = #tpu.pipeline_mode<synchronous>, transform_indices = @transform_6, window_bounds = array<i64: 1, 128>}, {transform_indices = @transform_7, window_bounds = array<i64: 8, 128>}]} {
    %c0 = arith.constant 0 : index
    %c0_0 = arith.constant 0 : index
    %0 = vector.load %arg1[%c0, %c0_0] : memref<8x128xf32, #tpu.memory_space<vmem>>, vector<8x128xf32>
    %c0_1 = arith.constant 0 : index
    %c0_2 = arith.constant 0 : index
    %1 = vector.load %arg2[%c0_1, %c0_2] : memref<128x128xbf16, #tpu.memory_space<vmem>>, vector<128x128xbf16>
    %c0_3 = arith.constant 0 : index
    %c0_4 = arith.constant 0 : index
    %2 = vector.load %arg3[%c0_3, %c0_4] : memref<1x128xf32, #tpu.memory_space<vmem>>, vector<1x128xf32>
    %3 = arith.truncf %0 : vector<8x128xf32> to vector<8x128xbf16>
    %cst = arith.constant dense<0.000000e+00> : vector<8x128xf32>
    %4 = tpu.matmul %3, %1, %cst {dimension_numbers = #tpu.dot_dimension_numbers<[1], [0], [0], [1], [0, 0, 1, 1], [], []>} : vector<8x128xbf16>, vector<128x128xbf16>, vector<8x128xf32> -> vector<8x128xf32>
    %5 = vector.broadcast %2 : vector<1x128xf32> to vector<8x128xf32>
    %6 = arith.addf %4, %5 : vector<8x128xf32>
    %cst_5 = arith.constant 0.000000e+00 : f32
    %7 = vector.broadcast %cst_5 : f32 to vector<8x128xf32>
    %8 = arith.maximumf %6, %7 : vector<8x128xf32>
    %c0_6 = arith.constant 0 : index
    %c0_7 = arith.constant 0 : index
    %9 = vector.load %arg4[%c0_6, %c0_7] : memref<128x128xbf16, #tpu.memory_space<vmem>>, vector<128x128xbf16>
    %c0_8 = arith.constant 0 : index
    %c0_9 = arith.constant 0 : index
    %10 = vector.load %arg5[%c0_8, %c0_9] : memref<1x128xf32, #tpu.memory_space<vmem>>, vector<1x128xf32>
    %11 = arith.truncf %8 : vector<8x128xf32> to vector<8x128xbf16>
    %cst_10 = arith.constant dense<0.000000e+00> : vector<8x128xf32>
    %12 = tpu.matmul %11, %9, %cst_10 {dimension_numbers = #tpu.dot_dimension_numbers<[1], [0], [0], [1], [0, 0, 1, 1], [], []>} : vector<8x128xbf16>, vector<128x128xbf16>, vector<8x128xf32> -> vector<8x128xf32>
    %13 = vector.broadcast %10 : vector<1x128xf32> to vector<8x128xf32>
    %14 = arith.addf %12, %13 : vector<8x128xf32>
    %cst_11 = arith.constant 0.000000e+00 : f32
    %15 = vector.broadcast %cst_11 : f32 to vector<8x128xf32>
    %16 = arith.maximumf %14, %15 : vector<8x128xf32>
    %c0_12 = arith.constant 0 : index
    %c0_13 = arith.constant 0 : index
    %17 = vector.load %arg6[%c0_12, %c0_13] : memref<128x128xbf16, #tpu.memory_space<vmem>>, vector<128x128xbf16>
    %c0_14 = arith.constant 0 : index
    %c0_15 = arith.constant 0 : index
    %18 = vector.load %arg7[%c0_14, %c0_15] : memref<1x128xf32, #tpu.memory_space<vmem>>, vector<1x128xf32>
    %19 = arith.truncf %16 : vector<8x128xf32> to vector<8x128xbf16>
    %cst_16 = arith.constant dense<0.000000e+00> : vector<8x128xf32>
    %20 = tpu.matmul %19, %17, %cst_16 {dimension_numbers = #tpu.dot_dimension_numbers<[1], [0], [0], [1], [0, 0, 1, 1], [], []>} : vector<8x128xbf16>, vector<128x128xbf16>, vector<8x128xf32> -> vector<8x128xf32>
    %21 = vector.broadcast %18 : vector<1x128xf32> to vector<8x128xf32>
    %22 = arith.addf %20, %21 : vector<8x128xf32>
    %c0_17 = arith.constant 0 : index
    %c0_18 = arith.constant 0 : index
    %23 = vector.load %arg8[%c0_17, %c0_18] : memref<8x128xf32, #tpu.memory_space<vmem>>, vector<8x128xf32>
    tpu.vector_store %arg8[%c0_17, %c0_18], %22 {strides = array<i32>} : memref<8x128xf32, #tpu.memory_space<vmem>>, vector<8x128xf32>,
    return
  }
  func.func @transform_0(%arg0: i32) -> (i32, i32) {
    %c0_i32 = arith.constant 0 : i32
    %c0_i32_0 = arith.constant 0 : i32
    return %arg0, %c0_i32 : i32, i32
  }
  func.func @transform_1(%arg0: i32) -> (i32, i32) {
    %c0_i32 = arith.constant 0 : i32
    %c0_i32_0 = arith.constant 0 : i32
    %c0_i32_1 = arith.constant 0 : i32
    return %c0_i32, %c0_i32_0 : i32, i32
  }
  func.func @transform_2(%arg0: i32) -> (i32, i32) {
    %c0_i32 = arith.constant 0 : i32
    %c0_i32_0 = arith.constant 0 : i32
    %c0_i32_1 = arith.constant 0 : i32
    return %c0_i32, %c0_i32_0 : i32, i32
  }
  func.func @transform_3(%arg0: i32) -> (i32, i32) {
    %c0_i32 = arith.constant 0 : i32
    %c0_i32_0 = arith.constant 0 : i32
    %c0_i32_1 = arith.constant 0 : i32
    return %c0_i32, %c0_i32_0 : i32, i32
  }
  func.func @transform_4(%arg0: i32) -> (i32, i32) {
    %c0_i32 = arith.constant 0 : i32
    %c0_i32_0 = arith.constant 0 : i32
    %c0_i32_1 = arith.constant 0 : i32
    return %c0_i32, %c0_i32_0 : i32, i32
  }
  func.func @transform_5(%arg0: i32) -> (i32, i32) {
    %c0_i32 = arith.constant 0 : i32
    %c0_i32_0 = arith.constant 0 : i32
    %c0_i32_1 = arith.constant 0 : i32
    return %c0_i32, %c0_i32_0 : i32, i32
  }
  func.func @transform_6(%arg0: i32) -> (i32, i32) {
    %c0_i32 = arith.constant 0 : i32
    %c0_i32_0 = arith.constant 0 : i32
    %c0_i32_1 = arith.constant 0 : i32
    return %c0_i32, %c0_i32_0 : i32, i32
  }
  func.func @transform_7(%arg0: i32) -> (i32, i32) {
    %c0_i32 = arith.constant 0 : i32
    %c0_i32_0 = arith.constant 0 : i32
    return %arg0, %c0_i32 : i32, i32
  }
}

module attributes {stable_mosaic.version = 11 : i64} {
  func.func @_fused_mlp_kernel(%arg0: i32, %arg1: memref<8x128xf32, #tpu.memory_space<vmem>>, %arg2: memref<128x128xbf16, #tpu.memory_space<vmem>>, %arg3: memref<1x128xf32, #tpu.memory_space<vmem>>, %arg4: memref<128x128xbf16, #tpu.memory_space<vmem>>, %arg5: memref<1x128xf32, #tpu.memory_space<vmem>>, %arg6: memref<128x128xbf16, #tpu.memory_space<vmem>>, %arg7: memref<1x128xf32, #tpu.memory_space<vmem>>, %arg8: memref<8x128xf32, #tpu.memory_space<vmem>>) attributes {dimension_semantics = [#tpu.dimension_semantics<parallel>], iteration_bounds = array<i64: 2>, scalar_prefetch = 0 : i64, scratch_operands = 0 : i64, tpu.core_type = #tpu.core_type<tc>, window_params = [{transform_indices = @transform_0, window_bounds = array<i64: 8, 128>}, {pipeline_mode = #tpu.pipeline_mode<synchronous>, transform_indices = @transform_1, window_bounds = array<i64: 128, 128>}, {pipeline_mode = #tpu.pipeline_mode<synchronous>, transform_indices = @transform_2, window_bounds = array<i64: 1, 128>}, {pipeline_mode = #tpu.pipeline_mode<synchronous>, transform_indices = @transform_3, window_bounds = array<i64: 128, 128>}, {pipeline_mode = #tpu.pipeline_mode<synchronous>, transform_indices = @transform_4, window_bounds = array<i64: 1, 128>}, {pipeline_mode = #tpu.pipeline_mode<synchronous>, transform_indices = @transform_5, window_bounds = array<i64: 128, 128>}, {pipeline_mode = #tpu.pipeline_mode<synchronous>, transform_indices = @transform_6, window_bounds = array<i64: 1, 128>}, {transform_indices = @transform_7, window_bounds = array<i64: 8, 128>}]} {
    %c0 = arith.constant 0 : index
    %c0_0 = arith.constant 0 : index
    %0 = vector.load %arg1[%c0, %c0_0] : memref<8x128xf32, #tpu.memory_space<vmem>>, vector<8x128xf32>
    %c0_1 = arith.constant 0 : index
    %c0_2 = arith.constant 0 : index
    %1 = vector.load %arg2[%c0_1, %c0_2] : memref<128x128xbf16, #tpu.memory_space<vmem>>, vector<128x128xbf16>
    %c0_3 = arith.constant 0 : index
    %c0_4 = arith.constant 0 : index
    %2 = vector.load %arg3[%c0_3, %c0_4] : memref<1x128xf32, #tpu.memory_space<vmem>>, vector<1x128xf32>
    %3 = arith.truncf %0 : vector<8x128xf32> to vector<8x128xbf16>
    %cst = arith.constant dense<0.000000e+00> : vector<8x128xf32>
    %4 = tpu.matmul %3, %1, %cst {dimension_numbers = #tpu.dot_dimension_numbers<[1], [0], [0], [1], [0, 0, 1, 1], [], []>} : vector<8x128xbf16>, vector<128x128xbf16>, vector<8x128xf32> -> vector<8x128xf32>
    %5 = vector.broadcast %2 : vector<1x128xf32> to vector<8x128xf32>
    %6 = arith.addf %4, %5 : vector<8x128xf32>
    %cst_5 = arith.constant 0.000000e+00 : f32
    %7 = vector.broadcast %cst_5 : f32 to vector<8x128xf32>
    %8 = arith.maximumf %6, %7 : vector<8x128xf32>
    %c0_6 = arith.constant 0 : index
    %c0_7 = arith.constant 0 : index
    %9 = vector.load %arg4[%c0_6, %c0_7] : memref<128x128xbf16, #tpu.memory_space<vmem>>, vector<128x128xbf16>
    %c0_8 = arith.constant 0 : index
    %c0_9 = arith.constant 0 : index
    %10 = vector.load %arg5[%c0_8, %c0_9] : memref<1x128xf32, #tpu.memory_space<vmem>>, vector<1x128xf32>
    %11 = arith.truncf %8 : vector<8x128xf32> to vector<8x128xbf16>
    %cst_10 = arith.constant dense<0.000000e+00> : vector<8x128xf32>
    %12 = tpu.matmul %11, %9, %cst_10 {dimension_numbers = #tpu.dot_dimension_numbers<[1], [0], [0], [1], [0, 0, 1, 1], [], []>} : vector<8x128xbf16>, vector<128x128xbf16>, vector<8x128xf32> -> vector<8x128xf32>
    %13 = vector.broadcast %10 : vector<1x128xf32> to vector<8x128xf32>
    %14 = arith.addf %12, %13 : vector<8x128xf32>
    %cst_11 = arith.constant 0.000000e+00 : f32
    %15 = vector.broadcast %cst_11 : f32 to vector<8x128xf32>
    %16 = arith.maximumf %14, %15 : vector<8x128xf32>
    %c0_12 = arith.constant 0 : index
    %c0_13 = arith.constant 0 : index
    %17 = vector.load %arg6[%c0_12, %c0_13] : memref<128x128xbf16, #tpu.memory_space<vmem>>, vector<128x128xbf16>
    %c0_14 = arith.constant 0 : index
    %c0_15 = arith.constant 0 : index
    %18 = vector.load %arg7[%c0_14, %c0_15] : memref<1x128xf32, #tpu.memory_space<vmem>>, vector<1x128xf32>
    %19 = arith.truncf %16 : vector<8x128xf32> to vector<8x128xbf16>
    %cst_16 = arith.constant dense<0.000000e+00> : vector<8x128xf32>
    %20 = tpu.matmul %19, %17, %cst_16 {dimension_numbers = #tpu.dot_dimension_numbers<[1], [0], [0], [1], [0, 0, 1, 1], [], []>} : vector<8x128xbf16>, vector<128x128xbf16>, vector<8x128xf32> -> vector<8x128xf32>
    %21 = vector.broadcast %18 : vector<1x128xf32> to vector<8x128xf32>
    %22 = arith.addf %20, %21 : vector<8x128xf32>
    %c0_17 = arith.constant 0 : index
    %c0_18 = arith.constant 0 : index
    %23 = vector.load %arg8[%c0_17, %c0_18] : memref<8x128xf32, #tpu.memory_space<vmem>>, vector<8x128xf32>
    tpu.vector_store %arg8[%c0_17, %c0_18], %22 {strides = array<i32>} : memref<8x128xf32, #tpu.memory_space<vmem>>, vector<8x128xf32>,
    return
  }
  func.func @transform_0(%arg0: i32) -> (i32, i32) {
    %c0_i32 = arith.constant 0 : i32
    %c0_i32_0 = arith.constant 0 : i32
    return %arg0, %c0_i32 : i32, i32
  }
  func.func @transform_1(%arg0: i32) -> (i32, i32) {
    %c0_i32 = arith.constant 0 : i32
    %c0_i32_0 = arith.constant 0 : i32
    %c0_i32_1 = arith.constant 0 : i32
    return %c0_i32, %c0_i32_0 : i32, i32
  }
  func.func @transform_2(%arg0: i32) -> (i32, i32) {
    %c0_i32 = arith.constant 0 : i32
    %c0_i32_0 = arith.constant 0 : i32
    %c0_i32_1 = arith.constant 0 : i32
    return %c0_i32, %c0_i32_0 : i32, i32
  }
  func.func @transform_3(%arg0: i32) -> (i32, i32) {
    %c0_i32 = arith.constant 0 : i32
    %c0_i32_0 = arith.constant 0 : i32
    %c0_i32_1 = arith.constant 0 : i32
    return %c0_i32, %c0_i32_0 : i32, i32
  }
  func.func @transform_4(%arg0: i32) -> (i32, i32) {
    %c0_i32 = arith.constant 0 : i32
    %c0_i32_0 = arith.constant 0 : i32
    %c0_i32_1 = arith.constant 0 : i32
    return %c0_i32, %c0_i32_0 : i32, i32
  }
  func.func @transform_5(%arg0: i32) -> (i32, i32) {
    %c0_i32 = arith.constant 0 : i32
    %c0_i32_0 = arith.constant 0 : i32
    %c0_i32_1 = arith.constant 0 : i32
    return %c0_i32, %c0_i32_0 : i32, i32
  }
  func.func @transform_6(%arg0: i32) -> (i32, i32) {
    %c0_i32 = arith.constant 0 : i32
    %c0_i32_0 = arith.constant 0 : i32
    %c0_i32_1 = arith.constant 0 : i32
    return %c0_i32, %c0_i32_0 : i32, i32
  }
  func.func @transform_7(%arg0: i32) -> (i32, i32) {
    %c0_i32 = arith.constant 0 : i32
    %c0_i32_0 = arith.constant 0 : i32
    return %arg0, %c0_i32 : i32, i32
  }
}

</mosaic_0001>

<bundles_post_ra>
// kernel: tpu_custom_call.1
= control target key start
LH: loop header
LB: loop body
LE: loop exit
PB: predicated region body
PF: predicated region fallthrough
CT: control target
= control target key end

     0   :  { %s1493_s0 = inlined_call_operand.hbm [shape: f32[16,128], index: 0, kind: input, shape index: {}]   ;;  %s1494_s1 = inlined_call_operand.hbm [shape: bf16[128,128], index: 1, kind: input, shape index: {}]   ;;  %s1495_s2 = inlined_call_operand.vmem [shape: f32[1,128], index: 2, kind: input, shape index: {}]   ;;  %s1496_s3 = inlined_call_operand.hbm [shape: bf16[128,128], index: 3, kind: input, shape index: {}]   ;;  %s1497_s4 = inlined_call_operand.vmem [shape: f32[1,128], index: 4, kind: input, shape index: {}]   ;;  %s1498_s5 = inlined_call_operand.hbm [shape: bf16[128,128], index: 5, kind: input, shape index: {}]   ;;  %s1499_s6 = inlined_call_operand.vmem [shape: f32[1,128], index: 6, kind: input, shape index: {}]   ;;  %s1500_s7 = inlined_call_operand.hbm [shape: f32[16,128], index: 7, kind: output, shape index: {}]  }
   0x1   :  { %1505 = sst [smem:[#allocation15_spill]] %s1494_s1 }
   0x2   :  { %1506 = sst [smem:[#allocation16_spill]] %s1496_s3 }
   0x3   :  { %12 = vsyncpa [#allocation3], 0 }
   0x4   :  { %14 = vsyncpa [#allocation3 + $0x1], 0 }
   0x5   :  { %15 = vsyncpa [#allocation6], 0 }
   0x6   :  { %16 = vsyncpa [#allocation9], 0 }
   0x7   :  { %17 = vsyncpa [#allocation4], 0 }
   0x8   :  { %19 = vsyncpa [#allocation4 + $0x1], 0  ;;  %s1258_s24 = smov 0   ;;  %s1260_s25 = smov 0  }
   0x9   :  { %s1262_s26 = smov 0   ;;  %s1264_s27 = smov 0  }
   0xa LB: > { %s1279_s28 = sadd.s32 4294967295, %s1207_s27   ;;  %s792_s29 = sadd.s32 4294967294, %s1207_s27   ;;  %s1207_s27 = sphi %s1264_s27, %s1528_s27   ;;  %s1203_s26 = sphi %s1262_s26, %s1527_s26   ;;  %s1199_s25 = sphi %s1260_s25, %s1526_s25   ;;  %s1195_s24 = sphi %s1258_s24, %s1525_s24  }
   0xb   : > { %p45_p0 = scmp.ne.s32.totalorder %s1199_s25, %s1195_s24  ;;  %p1501_p1 = scmp.eq.s32.totalorder %s1279_s28, 0 }
   0xc   : > { %p201_p3 = scmp.eq.s32.totalorder %s792_s29, 1  ;;  %p793_p5 = scmp.ge.s32.totalorder %s1207_s27, 1 }
   0xd   : > { %p1288_p4 = por %p1501_p1, %p45_p0  ;;  %p208_p7 = scmp.lt.s32.totalorder %s1207_s27, 3 }
   0xe   : > { %p1293_p6 = por %p201_p3, %p45_p0  ;;  %s1209_s10 = smov [#allocation5]  }
   0xf   : > { %s1507_s30 = scalar_select %p1288_p4, 1, 0 }
  0x10   : > { %s1508_s8 = scalar_select %p1293_p6, 1, 0 }
  0x11   : > { %p1298_p8 = pnand %p793_p5, %p208_p7  ;;  %s220_s11 = sshll.u32 %s1209_s10, 4  ;;  %s221_s11 = int_to_ptr.vmem [resolvable:$true] %s220_s11 }
  0x12   : > { %s1210_s13 = smov [#allocation7]   ;;  %s1211_s15 = smov [#allocation8]  }
  0x13   : > { %s1509_s9 = scalar_select %p1298_p8, 1, 0 }
  0x14   : > { %p940_p9 = pneg %p1298_p8  ;;  %s236_s14 = sshll.u32 %s1210_s13, 4  ;;  %s237_s14 = int_to_ptr.vmem [resolvable:$true] %s236_s14 }
  0x15   : > { %s252_s16 = sshll.u32 %s1211_s15, 4  ;;  %s1040_s17 = scalar_lea.vmem %s221_s11, 1024  ;;  %s253_s16 = int_to_ptr.vmem [resolvable:$true] %s252_s16 }
  0x16   : > { %p1307_p11 = pnand %p940_p9, %p1501_p1  ;;  %p1041_p13 = scmp.ne.s32.totalorder %s221_s11, %s1040_s17 }
  0x17   : > { %p1048_p5 = scmp.lt.s32.totalorder %s221_s11, %s221_s11  ;;  %p1049_p7 = scmp.lt.s32.totalorder %s1040_s17, %s1040_s17 }
  0x18   : > { %p1031_p12 = pneg %p1307_p11 }
  0x19   : > { %p1050_p9 = por %p1049_p7, %p1048_p5 }
  0x1a   : > { %p1043_p0 = pnand %p1041_p13, %p1031_p12 }
  0x1c   : > { %p1044_p3 = pneg %p1043_p0 }
  0x1e   : > { %p1051_p10 = pnand %p1050_p9, %p1044_p3 }
  0x20   : > { %1054 = shalt.err (!%p1051_p10)
}
  0x21   : > { %s1212_s18 = smov 64   ;;  %s1213_s19 = smov 4  }
  0x22   : > { %s1511_s1 = sld [smem:[#allocation15_spill]]  ;;  %s1066_s22 = scalar_lea.vmem %s237_s14, 1024 }
  0x23   : > { %p1067_p1 = scmp.ne.s32.totalorder %s237_s14, %s1066_s22  ;;  %p1074_p2 = scmp.lt.s32.totalorder %s237_s14, %s237_s14 }
  0x24   : > { %p1075_p6 = scmp.lt.s32.totalorder %s1066_s22, %s1066_s22 }
  0x25   : > { %p1069_p13 = pnand %p1067_p1, %p1031_p12 }
  0x26   : > { %p1076_p5 = por %p1075_p6, %p1074_p2 }
  0x27   : > { %p1070_p0 = pneg %p1069_p13 }
  0x28   : > { %943 = dma.hbm_to_vmem [thread:$0]  (!%p1307_p11), %s1511_s1, 1024, %s221_s11, [#allocation6], %s1212_s18, %s1212_s18, %s1213_s19  }
  0x29   : > { %p1077_p3 = pnand %p1076_p5, %p1070_p0 }
  0x2b   : > { %1080 = shalt.err (!%p1077_p3)
}
  0x2c   : > { %s1512_s3 = sld [smem:[#allocation16_spill]]  ;;  %s1092_s10 = scalar_lea.vmem %s253_s16, 1024 }
  0x2d   : > { %p1093_p10 = scmp.ne.s32.totalorder %s253_s16, %s1092_s10  ;;  %p1100_p9 = scmp.lt.s32.totalorder %s253_s16, %s253_s16 }
  0x2e   : > { %p1101_p13 = scmp.lt.s32.totalorder %s1092_s10, %s1092_s10 }
  0x2f   : > { %p1095_p7 = pnand %p1093_p10, %p1031_p12 }
  0x30   : > { %p1102_p4 = por %p1101_p13, %p1100_p9 }
  0x31   : > { %p1096_p1 = pneg %p1095_p7 }
  0x32   : > { %946 = dma.hbm_to_vmem [thread:$0]  (!%p1307_p11), %s1512_s3, 1024, %s237_s14, [#allocation6], %s1212_s18, %s1212_s18, %s1213_s19  }
  0x33   : > { %p1103_p2 = pnand %p1102_p4, %p1096_p1 }
  0x35   : > { %1106 = shalt.err (!%p1103_p2)
}
  0x36   : > { %949 = dma.hbm_to_vmem [thread:$0]  (!%p1307_p11), %s1498_s5, 1024, %s253_s16, [#allocation9], %s1212_s18, %s1212_s18, %s1213_s19  }
  0x37   : > { %s1338_s14 = sadd.s32 1, %s1207_s27   ;;  %s32_s12 = sadd.s32 1, %s1203_s26 }
  0x38   : > { %s29_s15 = ssub.s32 %s1207_s27, %s1338_s14  ;;  %p39_p6 = scmp.ne.s32.totalorder %s1203_s26, %s1199_s25 }
  0x39   : > { %p30_p4 = scmp.eq.s32.totalorder %s29_s15, 0  ;;  %p40_p12 = scmp.eq.s32.totalorder %s1207_s27, 0 }
  0x3a   : > { %p961_p0 = scmp.lt.s32.totalorder %s1207_s27, 2  ;;  %p1513_p3 = scmp.eq.s32.totalorder %s1279_s28, 1 }
  0x3b   : > { %s1348_s17 = scalar_select %p30_p4, %s1203_s26, %s32_s12  }
  0x3c   : > { %p41_p5 = por %p40_p12, %p39_p6  ;;  %p1352_p10 = por %p1513_p3, %p39_p6 }
  0x3d   : > { %s269_s21 = sand.u32 1, %s1203_s26   ;;  %s799_s22 = sshll.u32 %s1207_s27, 7 }
  0x3e   : > { %s1514_s20 = scalar_select %p1352_p10, 1, 0 }
  0x3f   : > { %s798_s16 = sshll.u32 %s269_s21, 3  ;;  %s1361_s23 = scalar_lea.hbm %s1493_s0, %s799_s22 }
  0x40   : > { %s273_s29 = scalar_lea.vmem [#allocation2], %s798_s16  ;;  %p1363_p11 = pnand %p961_p0, %p41_p5 }
  0x41   : > { %s280_s10 = sshll.u32 %s273_s29, 4  ;;  %s270_s13 = scalar_lea.sflag [#allocation3], %s269_s21  ;;  %s281_s10 = int_to_ptr.vmem [resolvable:$true] %s280_s10 }
  0x42   : > { %s1107_s15 = scalar_lea.hbm %s1361_s23, 128  ;;  %p1109_p1 = pneg %p1363_p11 }
  0x43   : > { %p1108_p7 = scmp.ne.s32.totalorder %s1361_s23, %s1107_s15  ;;  %s1112_s18 = scalar_lea.hbm %s1493_s0, 256 }
  0x44   : > { %p1113_p2 = scmp.lt.s32.totalorder %s1361_s23, %s1493_s0  ;;  %p1114_p4 = scmp.lt.s32.totalorder %s1112_s18, %s1107_s15 }
  0x45   : > { %p1110_p9 = pnand %p1109_p1, %p1108_p7 }
  0x46   : > { %p1115_p6 = por %p1114_p4, %p1113_p2 }
  0x47   : > { %p1111_p13 = pneg %p1110_p9 }
  0x49   : > { %p1116_p12 = pnand %p1115_p6, %p1111_p13 }
  0x4b   : > { %1119 = shalt.err (!%p1116_p12)
}
  0x4c   : > { %s1120_s29 = scalar_lea.vmem %s281_s10, 128  ;;  %s1214_s21 = smov [#allocation2]  }
  0x4d   : > { %p1121_p0 = scmp.ne.s32.totalorder %s281_s10, %s1120_s29  ;;  %s1125_s1 = sshll.u32 %s1214_s21, 4  ;;  %s1126_s1 = int_to_ptr.vmem [resolvable:$false] %s1125_s1 }
  0x4e   : > { %s1127_s3 = scalar_lea.vmem %s1126_s1, 256  ;;  %p1128_p7 = scmp.lt.s32.totalorder %s281_s10, %s1126_s1 }
  0x4f   : > { %p1123_p5 = pnand %p1121_p0, %p1109_p1  ;;  %p1129_p9 = scmp.lt.s32.totalorder %s1127_s3, %s1120_s29 }
  0x51   : > { %p1124_p3 = pneg %p1123_p5  ;;  %p1130_p10 = por %p1129_p9, %p1128_p7 }
  0x53   : > { %p1131_p8 = pnand %p1130_p10, %p1124_p3 }
  0x55   : > { %1134 = shalt.err (!%p1131_p8)
}
  0x56   : > { %953 = dma.hbm_to_vmem [thread:$0]  (!%p1363_p11), %s1361_s23, 128, %s281_s10, %s270_s13  }
  0x57   : > { %p1516_p13 = scmp.ne.s32.totalorder %s1509_s9, 0 }
  0x58   : > { %s1384_s15 = sand.u32 (!%p1516_p13), 1, %s1199_s25   ;;  %p1517_p8 = scmp.ne.s32.totalorder (!%p1516_p13), %s1507_s30, 0 }
  0x59   : > { %289 = sbr.rel (%p1516_p13) target bundleno = 742 (0x2e6), region = 48  ;;  %s801_s12 = sshll.u32 (!%p1516_p13), %s1384_s15, 3 }
  0x5a   : > { %s292_s1 = scalar_lea.sflag (!%p1516_p13), [#allocation3], %s1384_s15  ;;  %s1390_s3 = scalar_lea.vmem (!%p1516_p13), [#allocation2], %s801_s12 }
  0x5e   : > { %1178 = dma.done.wait (%p1517_p8), %s292_s1, 128  }
  0x5f   : > { %1180 = vsyncadd (%p1517_p8), %s292_s1, 4294967168  ;;  %p1518_p10 = scmp.eq.s32.totalorder %s1279_s28, 0 }
  0x61   : > { %1182 = dma.done.wait (%p1518_p10), [#allocation6], 2048   ;;  %p1519_p11 = pmov %p1518_p10 }
  0x62   : > { %p1520_p1 = pmov %p1518_p10 }
  0x63   : > { %1184 = vsyncadd (%p1519_p11), [#allocation6], 4294965248 }
  0x64   : > { %1186 = dma.done.wait (%p1520_p1), [#allocation9], 1024   ;;  %p1521_p2 = pmov %p1520_p1 }
  0x65   : > { %v1215_v0 = vmov 0.0   ;;  %vm1216_vm0 = vmmov 0   ;;  %v1005_v1 = vld [vmem:[#allocation5 + $0x38] sm:$0xff]   ;;  %v1006_v2 = vld [vmem:[#allocation5 + $0x30] sm:$0xff]   ;;  %v1007_v3 = vld [vmem:[#allocation5 + $0x28] sm:$0xff]   ;;  %s834_s22 = sshll.u32 %s1279_s28, 7 }
  0x66   : > { %1188 = vsyncadd (%p1521_p2), [#allocation9], 4294966272  ;;  %864 = vmatprep.subr.bf16.mxu0 %v1215_v0  ;;  %880 = vmatprep.mubr.msk.bf16.mxu0 %vm1216_vm0, %v1215_v0  ;;  %v1013_v4 = vld [vmem:[#allocation7 + $0x38] sm:$0xff]   ;;  %v1008_v5 = vld [vmem:[#allocation5 + $0x20] sm:$0xff]   ;;  %s337_s18 = scalar_lea.vmem [#allocation10], %s801_s12  ;;  %s1450_s21 = scalar_lea.hbm %s1500_s7, %s834_s22 }
  0x67   : > { %884 = vmatprep.subr.bf16.mxu1 %v1215_v0  ;;  %900 = vmatprep.mubr.msk.bf16.mxu1 %vm1216_vm0, %v1215_v0  ;;  %v1014_v6 = vld [vmem:[#allocation7 + $0x30] sm:$0xff]   ;;  %v1009_v7 = vld [vmem:[#allocation5 + $0x18] sm:$0xff]   ;;  %v1015_v8 = vld [vmem:[#allocation7 + $0x28] sm:$0xff]   ;;  %s693_s19 = sshll.u32 %s337_s18, 4  ;;  %s680_s1 = scalar_lea.sflag [#allocation4], %s1384_s15  ;;  %s1452_s19 = int_to_ptr.vmem [resolvable:$true] %s693_s19 }
  0x68   : > { %865 = vmatpush3.bf16.msra.mxu0 %v1005_v1  ;;  %885 = vmatpush3.bf16.msra.mxu1 %v1013_v4  ;;  %v1010_v9 = vld [vmem:[#allocation5 + $0x10] sm:$0xff]   ;;  %v1016_v10 = vld [vmem:[#allocation7 + $0x20] sm:$0xff]   ;;  %v1011_v11 = vld [vmem:[#allocation5 + $0x8] sm:$0xff]   ;;  %s1135_s28 = scalar_lea.vmem %s1452_s19, 128  ;;  %p1522_p6 = scmp.ne.s32.totalorder %s1514_s20, 0 }
  0x69   : > { %866 = vmatprep.subr.bf16.mxu0 %v1215_v0  ;;  %886 = vmatprep.subr.bf16.mxu1 %v1215_v0  ;;  %v1017_v12 = vld [vmem:[#allocation7 + $0x18] sm:$0xff]   ;;  %v1012_v13 = vld [vmem:[#allocation5] sm:$0xff]   ;;  %v1018_v15 = vld [vmem:[#allocation7 + $0x10] sm:$0xff]   ;;  %p1136_p4 = scmp.ne.s32.totalorder %s1452_s19, %s1135_s28  ;;  %s1217_s12 = smov [#allocation10]  }
  0x6a   : > { %v339_v14 = vld [vmem:[%s1390_s3] sm:$0xff]  ;;  %v1019_v17 = vld [vmem:[#allocation7 + $0x8] sm:$0xff]   ;;  %v1020_v18 = vld [vmem:[#allocation7] sm:$0xff]   ;;  %s1139_s3 = sshll.u32 %s1217_s12, 4  ;;  %s1140_s3 = int_to_ptr.vmem [resolvable:$false] %s1139_s3 }
  0x6b   : > { %v357_v16 = vpack.c.bf16 %v339_v14, %v339_v14  ;;  %v1021_v19 = vld [vmem:[#allocation8 + $0x38] sm:$0xff]   ;;  %v1022_v20 = vld [vmem:[#allocation8 + $0x30] sm:$0xff]   ;;  %v1023_v21 = vld [vmem:[#allocation8 + $0x28] sm:$0xff]   ;;  %p1137_p12 = pnand %p1136_p4, %p1522_p6  ;;  %s1141_s30 = scalar_lea.vmem %s1140_s3, 256 }
  0x6c   : > { %867 = vmatpush3.bf16.msra.mxu0 %v1006_v2  ;;  %887 = vmatpush3.bf16.msra.mxu1 %v1014_v6  ;;  %v1024_v22 = vld [vmem:[#allocation8 + $0x20] sm:$0xff]   ;;  %v1025_v23 = vld [vmem:[#allocation8 + $0x18] sm:$0xff]   ;;  %v1026_v24 = vld [vmem:[#allocation8 + $0x10] sm:$0xff]   ;;  %p1142_p5 = scmp.lt.s32.totalorder %s1452_s19, %s1140_s3  ;;  %p1143_p3 = scmp.lt.s32.totalorder %s1141_s30, %s1135_s28 }
  0x6d   : > { %868 = vmatprep.subr.bf16.mxu0 %v1215_v0  ;;  %888 = vmatprep.subr.bf16.mxu1 %v1215_v0  ;;  %v806_v25 = vld [vmem:[%s1495_s2] ss:$0 sm:$0xff]  ;;  %v1027_v33 = vld [vmem:[#allocation8 + $0x8] sm:$0xff]   ;;  %v1028_v34 = vld [vmem:[#allocation8] sm:$0xff]   ;;  %p1138_p0 = pneg %p1137_p12 }
  0x6e   : > { %v815_v35 = vld [vmem:[%s1497_s4] ss:$0 sm:$0xff]  ;;  %p1144_p7 = por %p1143_p3, %p1142_p5 }
  0x6f   : > { %v824_v43 = vld [vmem:[%s1499_s6] ss:$0 sm:$0xff] }
  0x70   : > { %869 = vmatpush3.bf16.msra.mxu0 %v1007_v3  ;;  %889 = vmatpush3.bf16.msra.mxu1 %v1015_v8  ;;  %p1145_p9 = pnand %p1144_p7, %p1138_p0 }
  0x71   : > { %870 = vmatprep.subr.bf16.mxu0 %v1215_v0  ;;  %890 = vmatprep.subr.bf16.mxu1 %v1215_v0 }
  0x74   : > { %871 = vmatpush3.bf16.msra.mxu0 %v1008_v5  ;;  %891 = vmatpush3.bf16.msra.mxu1 %v1016_v10 }
  0x75   : > { %872 = vmatprep.subr.bf16.mxu0 %v1215_v0  ;;  %892 = vmatprep.subr.bf16.mxu1 %v1215_v0 }
  0x78   : > { %873 = vmatpush3.bf16.msra.mxu0 %v1009_v7  ;;  %893 = vmatpush3.bf16.msra.mxu1 %v1017_v12 }
  0x79   : > { %874 = vmatprep.subr.bf16.mxu0 %v1215_v0  ;;  %894 = vmatprep.subr.bf16.mxu1 %v1215_v0 }
  0x7c   : > { %875 = vmatpush3.bf16.msra.mxu0 %v1010_v9  ;;  %895 = vmatpush3.bf16.msra.mxu1 %v1018_v15 }
  0x7d   : > { %876 = vmatprep.subr.bf16.mxu0 %v1215_v0  ;;  %896 = vmatprep.subr.bf16.mxu1 %v1215_v0 }
  0x80   : > { %877 = vmatpush3.bf16.msra.mxu0 %v1011_v11  ;;  %897 = vmatpush3.bf16.msra.mxu1 %v1019_v17 }
  0x81   : > { %878 = vmatprep.subr.bf16.mxu0 %v1215_v0  ;;  %898 = vmatprep.subr.bf16.mxu1 %v1215_v0 }
  0x84   : > { %879 = vmatpush3.bf16.msra.mxu0 %v1012_v13  ;;  %899 = vmatpush3.bf16.msra.mxu1 %v1020_v18 }
  0x85   : > { %904 = vmatprep.subr.bf16.mxu0 %v1215_v0 }
  0x87   : > { %881 = vmatmul.mubr.bf16.vlgmr.msra.gmra.mxu0 %v357_v16 }
  0x88   : > { %920 = vmatprep.mubr.msk.bf16.mxu0 %vm1216_vm0, %v1215_v0  ;;  %905 = vmatpush3.bf16.msra.mxu0 %v1021_v19 }
  0x89   : > { %906 = vmatprep.subr.bf16.mxu0 %v1215_v0 }
  0x8c   : > { %907 = vmatpush3.bf16.msra.mxu0 %v1022_v20 }
  0x8d   : > { %908 = vmatprep.subr.bf16.mxu0 %v1215_v0 }
  0x90   : > { %909 = vmatpush3.bf16.msra.mxu0 %v1023_v21 }
  0x91   : > { %910 = vmatprep.subr.bf16.mxu0 %v1215_v0 }
  0x94   : > { %911 = vmatpush3.bf16.msra.mxu0 %v1024_v22 }
  0x95   : > { %912 = vmatprep.subr.bf16.mxu0 %v1215_v0 }
  0x98   : > { %913 = vmatpush3.bf16.msra.mxu0 %v1025_v23 }
  0x99   : > { %914 = vmatprep.subr.bf16.mxu0 %v1215_v0 }
  0x9c   : > { %915 = vmatpush3.bf16.msra.mxu0 %v1026_v24 }
  0x9d   : > { %916 = vmatprep.subr.bf16.mxu0 %v1215_v0 }
  0xa0   : > { %917 = vmatpush3.bf16.msra.mxu0 %v1027_v33 }
  0xa1   : > { %918 = vmatprep.subr.bf16.mxu0 %v1215_v0 }
  0xa4   : > { %919 = vmatpush3.bf16.msra.mxu0 %v1028_v34 }
 0x147   : > { %v446_v26 = vpop.f32.mrf.mxu0 }
 0x148   : > { %v447_v27 = vadd.f32 %v806_v25, %v446_v26 }
 0x149   : > { %v882_v28 = vpop.f32.mrf.mxu0 }
 0x14a   : > { %v452_v29 = vmax.f32 %v447_v27, 0.0 }
 0x14b   : > { %v449_v30 = vpop.f32.mrf.mxu0 }
 0x14c   : > { %v470_v31 = vpack.c.bf16 %v452_v29, %v452_v29 }
 0x14d   : > { %v883_v32 = vpop.f32.mrf.mxu0 }
 0x14e   : > { %901 = vmatmul.mubr.bf16.vlgmr.msra.gmra.mxu1 %v470_v31 }
 0x20e   : > { %v559_v36 = vpop.f32.mrf.mxu1 }
 0x20f   : > { %v560_v37 = vadd.f32 %v815_v35, %v559_v36 }
 0x210   : > { %v902_v38 = vpop.f32.mrf.mxu1 }
 0x211   : > { %v565_v39 = vmax.f32 %v560_v37, 0.0 }
 0x212   : > { %v562_v40 = vpop.f32.mrf.mxu1 }
 0x213   : > { %v583_v41 = vpack.c.bf16 %v565_v39, %v565_v39 }
 0x214   : > { %v903_v42 = vpop.f32.mrf.mxu1 }
 0x215   : > { %921 = vmatmul.mubr.bf16.vlgmr.msra.gmra.mxu0 %v583_v41 }
 0x2d5   : > { %v672_v44 = vpop.f32.mrf.mxu0 }
 0x2d6   : > { %v673_v45 = vadd.f32 %v824_v43, %v672_v44 }
 0x2d7   : > { %v922_v46 = vpop.f32.mrf.mxu0 }
 0x2d8   : > { %678 = vst [vmem:[%s337_s18] sm:$0xff] %v673_v45 }
 0x2d9   : > { %v675_v47 = vpop.f32.mrf.mxu0 }
 0x2da   : > { %1148 = shalt.err (!%p1145_p9)
}
 0x2db   : > { %s1149_s9 = scalar_lea.hbm %s1450_s21, 128  ;;  %s1153_s10 = scalar_lea.hbm %s1500_s7, 256 }
 0x2dc   : > { %p1150_p13 = scmp.ne.s32.totalorder %s1450_s21, %s1149_s9  ;;  %p1154_p11 = scmp.lt.s32.totalorder %s1450_s21, %s1500_s7 }
 0x2dd   : > { %p1155_p1 = scmp.lt.s32.totalorder %s1153_s10, %s1149_s9 }
 0x2de   : > { %p1151_p8 = pnand %p1150_p13, %p1522_p6 }
 0x2df   : > { %p1156_p2 = por %p1155_p1, %p1154_p11 }
 0x2e0   : > { %p1152_p10 = pneg %p1151_p8 }
 0x2e2   : > { %p1157_p4 = pnand %p1156_p2, %p1152_p10 }
 0x2e4   : > { %1160 = shalt.err (!%p1157_p4)
}
 0x2e5   : > { %938 = dma.vmem_to_hbm [thread:$0]  (%p1522_p6), %s1452_s19, 128, %s1450_s21, %s680_s1   ;;  %v923_v48 = vpop.f32.mrf.mxu0 }
 0x2e6 PF: > { %s705_s22 = sand.u32 1, %s1195_s24   ;;  %p1523_p12 = scmp.ne.s32.totalorder %s1508_s8, 0 }
 0x2e7   : > { %p1524_p0 = scmp.ge.s32.totalorder %s1207_s27, 2  ;;  %s706_s18 = scalar_lea.sflag [#allocation4], %s705_s22 }
 0x2e9   : > { %p955_p5 = pnand %p1524_p0, %p1523_p12 }
 0x2eb   : > { %p956_p3 = pneg %p955_p5 }
 0x2ed   : > { %1190 = dma.done.wait (%p956_p3), %s706_s18, 128  }
 0x2ee   : > { %1192 = vsyncadd (%p956_p3), %s706_s18, 4294967168  ;;  %p22_p7 = scmp.ge.s32.totalorder %s1338_s14, 4   ;;  %s1525_s24 = smov %s1199_s25 }
 0x2ef   : > { %s1526_s25 = smov %s1203_s26  ;;  %s1527_s26 = smov %s1348_s17 }
 0x2f0   : > { %s1528_s27 = smov %s1338_s14  ;;  %24 = sbr.rel (!%p22_p7) target bundleno = 10 (0xa), region = 105 }
 0x2f5   :  { %711 = vsyncpa [#allocation3], 1 }
 0x2f6   :  { %713 = vsyncpa [#allocation3 + $0x1], 1 }
 0x2f7   :  { %714 = vsyncpa [#allocation6], 1 }
 0x2f8   :  { %715 = vsyncpa [#allocation9], 1 }
 0x2f9   :  { %716 = vsyncpa [#allocation4], 1 }
 0x2fa   :  { %718 = vsyncpa [#allocation4 + $0x1], 1 }

// kernel: tpu_custom_call.1
= control target key start
LH: loop header
LB: loop body
LE: loop exit
PB: predicated region body
PF: predicated region fallthrough
CT: control target
= control target key end

     0   :  { %s1493_s0 = inlined_call_operand.hbm [shape: f32[16,128], index: 0, kind: input, shape index: {}]   ;;  %s1494_s1 = inlined_call_operand.hbm [shape: bf16[128,128], index: 1, kind: input, shape index: {}]   ;;  %s1495_s2 = inlined_call_operand.vmem [shape: f32[1,128], index: 2, kind: input, shape index: {}]   ;;  %s1496_s3 = inlined_call_operand.hbm [shape: bf16[128,128], index: 3, kind: input, shape index: {}]   ;;  %s1497_s4 = inlined_call_operand.vmem [shape: f32[1,128], index: 4, kind: input, shape index: {}]   ;;  %s1498_s5 = inlined_call_operand.hbm [shape: bf16[128,128], index: 5, kind: input, shape index: {}]   ;;  %s1499_s6 = inlined_call_operand.vmem [shape: f32[1,128], index: 6, kind: input, shape index: {}]   ;;  %s1500_s7 = inlined_call_operand.hbm [shape: f32[16,128], index: 7, kind: output, shape index: {}]  }
   0x1   :  { %1505 = sst [smem:[#allocation15_spill]] %s1494_s1 }
   0x2   :  { %1506 = sst [smem:[#allocation16_spill]] %s1496_s3 }
   0x3   :  { %12 = vsyncpa [#allocation3], 0 }
   0x4   :  { %14 = vsyncpa [#allocation3 + $0x1], 0 }
   0x5   :  { %15 = vsyncpa [#allocation6], 0 }
   0x6   :  { %16 = vsyncpa [#allocation9], 0 }
   0x7   :  { %17 = vsyncpa [#allocation4], 0 }
   0x8   :  { %19 = vsyncpa [#allocation4 + $0x1], 0  ;;  %s1258_s24 = smov 0   ;;  %s1260_s25 = smov 0  }
   0x9   :  { %s1262_s26 = smov 0   ;;  %s1264_s27 = smov 0  }
   0xa LB: > { %s1279_s28 = sadd.s32 4294967295, %s1207_s27   ;;  %s792_s29 = sadd.s32 4294967294, %s1207_s27   ;;  %s1207_s27 = sphi %s1264_s27, %s1528_s27   ;;  %s1203_s26 = sphi %s1262_s26, %s1527_s26   ;;  %s1199_s25 = sphi %s1260_s25, %s1526_s25   ;;  %s1195_s24 = sphi %s1258_s24, %s1525_s24  }
   0xb   : > { %p45_p0 = scmp.ne.s32.totalorder %s1199_s25, %s1195_s24  ;;  %p1501_p1 = scmp.eq.s32.totalorder %s1279_s28, 0 }
   0xc   : > { %p201_p3 = scmp.eq.s32.totalorder %s792_s29, 1  ;;  %p793_p5 = scmp.ge.s32.totalorder %s1207_s27, 1 }
   0xd   : > { %p1288_p4 = por %p1501_p1, %p45_p0  ;;  %p208_p7 = scmp.lt.s32.totalorder %s1207_s27, 3 }
   0xe   : > { %p1293_p6 = por %p201_p3, %p45_p0  ;;  %s1209_s10 = smov [#allocation5]  }
   0xf   : > { %s1507_s30 = scalar_select %p1288_p4, 1, 0 }
  0x10   : > { %s1508_s8 = scalar_select %p1293_p6, 1, 0 }
  0x11   : > { %p1298_p8 = pnand %p793_p5, %p208_p7  ;;  %s220_s11 = sshll.u32 %s1209_s10, 4  ;;  %s221_s11 = int_to_ptr.vmem [resolvable:$true] %s220_s11 }
  0x12   : > { %s1210_s13 = smov [#allocation7]   ;;  %s1211_s15 = smov [#allocation8]  }
  0x13   : > { %s1509_s9 = scalar_select %p1298_p8, 1, 0 }
  0x14   : > { %p940_p9 = pneg %p1298_p8  ;;  %s236_s14 = sshll.u32 %s1210_s13, 4  ;;  %s237_s14 = int_to_ptr.vmem [resolvable:$true] %s236_s14 }
  0x15   : > { %s252_s16 = sshll.u32 %s1211_s15, 4  ;;  %s1040_s17 = scalar_lea.vmem %s221_s11, 1024  ;;  %s253_s16 = int_to_ptr.vmem [resolvable:$true] %s252_s16 }
  0x16   : > { %p1307_p11 = pnand %p940_p9, %p1501_p1  ;;  %p1041_p13 = scmp.ne.s32.totalorder %s221_s11, %s1040_s17 }
  0x17   : > { %p1048_p5 = scmp.lt.s32.totalorder %s221_s11, %s221_s11  ;;  %p1049_p7 = scmp.lt.s32.totalorder %s1040_s17, %s1040_s17 }
  0x18   : > { %p1031_p12 = pneg %p1307_p11 }
  0x19   : > { %p1050_p9 = por %p1049_p7, %p1048_p5 }
  0x1a   : > { %p1043_p0 = pnand %p1041_p13, %p1031_p12 }
  0x1c   : > { %p1044_p3 = pneg %p1043_p0 }
  0x1e   : > { %p1051_p10 = pnand %p1050_p9, %p1044_p3 }
  0x20   : > { %1054 = shalt.err (!%p1051_p10)
}
  0x21   : > { %s1212_s18 = smov 64   ;;  %s1213_s19 = smov 4  }
  0x22   : > { %s1511_s1 = sld [smem:[#allocation15_spill]]  ;;  %s1066_s22 = scalar_lea.vmem %s237_s14, 1024 }
  0x23   : > { %p1067_p1 = scmp.ne.s32.totalorder %s237_s14, %s1066_s22  ;;  %p1074_p2 = scmp.lt.s32.totalorder %s237_s14, %s237_s14 }
  0x24   : > { %p1075_p6 = scmp.lt.s32.totalorder %s1066_s22, %s1066_s22 }
  0x25   : > { %p1069_p13 = pnand %p1067_p1, %p1031_p12 }
  0x26   : > { %p1076_p5 = por %p1075_p6, %p1074_p2 }
  0x27   : > { %p1070_p0 = pneg %p1069_p13 }
  0x28   : > { %943 = dma.hbm_to_vmem [thread:$0]  (!%p1307_p11), %s1511_s1, 1024, %s221_s11, [#allocation6], %s1212_s18, %s1212_s18, %s1213_s19  }
  0x29   : > { %p1077_p3 = pnand %p1076_p5, %p1070_p0 }
  0x2b   : > { %1080 = shalt.err (!%p1077_p3)
}
  0x2c   : > { %s1512_s3 = sld [smem:[#allocation16_spill]]  ;;  %s1092_s10 = scalar_lea.vmem %s253_s16, 1024 }
  0x2d   : > { %p1093_p10 = scmp.ne.s32.totalorder %s253_s16, %s1092_s10  ;;  %p1100_p9 = scmp.lt.s32.totalorder %s253_s16, %s253_s16 }
  0x2e   : > { %p1101_p13 = scmp.lt.s32.totalorder %s1092_s10, %s1092_s10 }
  0x2f   : > { %p1095_p7 = pnand %p1093_p10, %p1031_p12 }
  0x30   : > { %p1102_p4 = por %p1101_p13, %p1100_p9 }
  0x31   : > { %p1096_p1 = pneg %p1095_p7 }
  0x32   : > { %946 = dma.hbm_to_vmem [thread:$0]  (!%p1307_p11), %s1512_s3, 1024, %s237_s14, [#allocation6], %s1212_s18, %s1212_s18, %s1213_s19  }
  0x33   : > { %p1103_p2 = pnand %p1102_p4, %p1096_p1 }
  0x35   : > { %1106 = shalt.err (!%p1103_p2)
}
  0x36   : > { %949 = dma.hbm_to_vmem [thread:$0]  (!%p1307_p11), %s1498_s5, 1024, %s253_s16, [#allocation9], %s1212_s18, %s1212_s18, %s1213_s19  }
  0x37   : > { %s1338_s14 = sadd.s32 1, %s1207_s27   ;;  %s32_s12 = sadd.s32 1, %s1203_s26 }
  0x38   : > { %s29_s15 = ssub.s32 %s1207_s27, %s1338_s14  ;;  %p39_p6 = scmp.ne.s32.totalorder %s1203_s26, %s1199_s25 }
  0x39   : > { %p30_p4 = scmp.eq.s32.totalorder %s29_s15, 0  ;;  %p40_p12 = scmp.eq.s32.totalorder %s1207_s27, 0 }
  0x3a   : > { %p961_p0 = scmp.lt.s32.totalorder %s1207_s27, 2  ;;  %p1513_p3 = scmp.eq.s32.totalorder %s1279_s28, 1 }
  0x3b   : > { %s1348_s17 = scalar_select %p30_p4, %s1203_s26, %s32_s12  }
  0x3c   : > { %p41_p5 = por %p40_p12, %p39_p6  ;;  %p1352_p10 = por %p1513_p3, %p39_p6 }
  0x3d   : > { %s269_s21 = sand.u32 1, %s1203_s26   ;;  %s799_s22 = sshll.u32 %s1207_s27, 7 }
  0x3e   : > { %s1514_s20 = scalar_select %p1352_p10, 1, 0 }
  0x3f   : > { %s798_s16 = sshll.u32 %s269_s21, 3  ;;  %s1361_s23 = scalar_lea.hbm %s1493_s0, %s799_s22 }
  0x40   : > { %s273_s29 = scalar_lea.vmem [#allocation2], %s798_s16  ;;  %p1363_p11 = pnand %p961_p0, %p41_p5 }
  0x41   : > { %s280_s10 = sshll.u32 %s273_s29, 4  ;;  %s270_s13 = scalar_lea.sflag [#allocation3], %s269_s21  ;;  %s281_s10 = int_to_ptr.vmem [resolvable:$true] %s280_s10 }
  0x42   : > { %s1107_s15 = scalar_lea.hbm %s1361_s23, 128  ;;  %p1109_p1 = pneg %p1363_p11 }
  0x43   : > { %p1108_p7 = scmp.ne.s32.totalorder %s1361_s23, %s1107_s15  ;;  %s1112_s18 = scalar_lea.hbm %s1493_s0, 256 }
  0x44   : > { %p1113_p2 = scmp.lt.s32.totalorder %s1361_s23, %s1493_s0  ;;  %p1114_p4 = scmp.lt.s32.totalorder %s1112_s18, %s1107_s15 }
  0x45   : > { %p1110_p9 = pnand %p1109_p1, %p1108_p7 }
  0x46   : > { %p1115_p6 = por %p1114_p4, %p1113_p2 }
  0x47   : > { %p1111_p13 = pneg %p1110_p9 }
  0x49   : > { %p1116_p12 = pnand %p1115_p6, %p1111_p13 }
  0x4b   : > { %1119 = shalt.err (!%p1116_p12)
}
  0x4c   : > { %s1120_s29 = scalar_lea.vmem %s281_s10, 128  ;;  %s1214_s21 = smov [#allocation2]  }
  0x4d   : > { %p1121_p0 = scmp.ne.s32.totalorder %s281_s10, %s1120_s29  ;;  %s1125_s1 = sshll.u32 %s1214_s21, 4  ;;  %s1126_s1 = int_to_ptr.vmem [resolvable:$false] %s1125_s1 }
  0x4e   : > { %s1127_s3 = scalar_lea.vmem %s1126_s1, 256  ;;  %p1128_p7 = scmp.lt.s32.totalorder %s281_s10, %s1126_s1 }
  0x4f   : > { %p1123_p5 = pnand %p1121_p0, %p1109_p1  ;;  %p1129_p9 = scmp.lt.s32.totalorder %s1127_s3, %s1120_s29 }
  0x51   : > { %p1124_p3 = pneg %p1123_p5  ;;  %p1130_p10 = por %p1129_p9, %p1128_p7 }
  0x53   : > { %p1131_p8 = pnand %p1130_p10, %p1124_p3 }
  0x55   : > { %1134 = shalt.err (!%p1131_p8)
}
  0x56   : > { %953 = dma.hbm_to_vmem [thread:$0]  (!%p1363_p11), %s1361_s23, 128, %s281_s10, %s270_s13  }
  0x57   : > { %p1516_p13 = scmp.ne.s32.totalorder %s1509_s9, 0 }
  0x58   : > { %s1384_s15 = sand.u32 (!%p1516_p13), 1, %s1199_s25   ;;  %p1517_p8 = scmp.ne.s32.totalorder (!%p1516_p13), %s1507_s30, 0 }
  0x59   : > { %289 = sbr.rel (%p1516_p13) target bundleno = 742 (0x2e6), region = 48  ;;  %s801_s12 = sshll.u32 (!%p1516_p13), %s1384_s15, 3 }
  0x5a   : > { %s292_s1 = scalar_lea.sflag (!%p1516_p13), [#allocation3], %s1384_s15  ;;  %s1390_s3 = scalar_lea.vmem (!%p1516_p13), [#allocation2], %s801_s12 }
  0x5e   : > { %1178 = dma.done.wait (%p1517_p8), %s292_s1, 128  }
  0x5f   : > { %1180 = vsyncadd (%p1517_p8), %s292_s1, 4294967168  ;;  %p1518_p10 = scmp.eq.s32.totalorder %s1279_s28, 0 }
  0x61   : > { %1182 = dma.done.wait (%p1518_p10), [#allocation6], 2048   ;;  %p1519_p11 = pmov %p1518_p10 }
  0x62   : > { %p1520_p1 = pmov %p1518_p10 }
  0x63   : > { %1184 = vsyncadd (%p1519_p11), [#allocation6], 4294965248 }
  0x64   : > { %1186 = dma.done.wait (%p1520_p1), [#allocation9], 1024   ;;  %p1521_p2 = pmov %p1520_p1 }
  0x65   : > { %v1215_v0 = vmov 0.0   ;;  %vm1216_vm0 = vmmov 0   ;;  %v1005_v1 = vld [vmem:[#allocation5 + $0x38] sm:$0xff]   ;;  %v1006_v2 = vld [vmem:[#allocation5 + $0x30] sm:$0xff]   ;;  %v1007_v3 = vld [vmem:[#allocation5 + $0x28] sm:$0xff]   ;;  %s834_s22 = sshll.u32 %s1279_s28, 7 }
  0x66   : > { %1188 = vsyncadd (%p1521_p2), [#allocation9], 4294966272  ;;  %864 = vmatprep.subr.bf16.mxu0 %v1215_v0  ;;  %880 = vmatprep.mubr.msk.bf16.mxu0 %vm1216_vm0, %v1215_v0  ;;  %v1013_v4 = vld [vmem:[#allocation7 + $0x38] sm:$0xff]   ;;  %v1008_v5 = vld [vmem:[#allocation5 + $0x20] sm:$0xff]   ;;  %s337_s18 = scalar_lea.vmem [#allocation10], %s801_s12  ;;  %s1450_s21 = scalar_lea.hbm %s1500_s7, %s834_s22 }
  0x67   : > { %884 = vmatprep.subr.bf16.mxu1 %v1215_v0  ;;  %900 = vmatprep.mubr.msk.bf16.mxu1 %vm1216_vm0, %v1215_v0  ;;  %v1014_v6 = vld [vmem:[#allocation7 + $0x30] sm:$0xff]   ;;  %v1009_v7 = vld [vmem:[#allocation5 + $0x18] sm:$0xff]   ;;  %v1015_v8 = vld [vmem:[#allocation7 + $0x28] sm:$0xff]   ;;  %s693_s19 = sshll.u32 %s337_s18, 4  ;;  %s680_s1 = scalar_lea.sflag [#allocation4], %s1384_s15  ;;  %s1452_s19 = int_to_ptr.vmem [resolvable:$true] %s693_s19 }
  0x68   : > { %865 = vmatpush3.bf16.msra.mxu0 %v1005_v1  ;;  %885 = vmatpush3.bf16.msra.mxu1 %v1013_v4  ;;  %v1010_v9 = vld [vmem:[#allocation5 + $0x10] sm:$0xff]   ;;  %v1016_v10 = vld [vmem:[#allocation7 + $0x20] sm:$0xff]   ;;  %v1011_v11 = vld [vmem:[#allocation5 + $0x8] sm:$0xff]   ;;  %s1135_s28 = scalar_lea.vmem %s1452_s19, 128  ;;  %p1522_p6 = scmp.ne.s32.totalorder %s1514_s20, 0 }
  0x69   : > { %866 = vmatprep.subr.bf16.mxu0 %v1215_v0  ;;  %886 = vmatprep.subr.bf16.mxu1 %v1215_v0  ;;  %v1017_v12 = vld [vmem:[#allocation7 + $0x18] sm:$0xff]   ;;  %v1012_v13 = vld [vmem:[#allocation5] sm:$0xff]   ;;  %v1018_v15 = vld [vmem:[#allocation7 + $0x10] sm:$0xff]   ;;  %p1136_p4 = scmp.ne.s32.totalorder %s1452_s19, %s1135_s28  ;;  %s1217_s12 = smov [#allocation10]  }
  0x6a   : > { %v339_v14 = vld [vmem:[%s1390_s3] sm:$0xff]  ;;  %v1019_v17 = vld [vmem:[#allocation7 + $0x8] sm:$0xff]   ;;  %v1020_v18 = vld [vmem:[#allocation7] sm:$0xff]   ;;  %s1139_s3 = sshll.u32 %s1217_s12, 4  ;;  %s1140_s3 = int_to_ptr.vmem [resolvable:$false] %s1139_s3 }
  0x6b   : > { %v357_v16 = vpack.c.bf16 %v339_v14, %v339_v14  ;;  %v1021_v19 = vld [vmem:[#allocation8 + $0x38] sm:$0xff]   ;;  %v1022_v20 = vld [vmem:[#allocation8 + $0x30] sm:$0xff]   ;;  %v1023_v21 = vld [vmem:[#allocation8 + $0x28] sm:$0xff]   ;;  %p1137_p12 = pnand %p1136_p4, %p1522_p6  ;;  %s1141_s30 = scalar_lea.vmem %s1140_s3, 256 }
  0x6c   : > { %867 = vmatpush3.bf16.msra.mxu0 %v1006_v2  ;;  %887 = vmatpush3.bf16.msra.mxu1 %v1014_v6  ;;  %v1024_v22 = vld [vmem:[#allocation8 + $0x20] sm:$0xff]   ;;  %v1025_v23 = vld [vmem:[#allocation8 + $0x18] sm:$0xff]   ;;  %v1026_v24 = vld [vmem:[#allocation8 + $0x10] sm:$0xff]   ;;  %p1142_p5 = scmp.lt.s32.totalorder %s1452_s19, %s1140_s3  ;;  %p1143_p3 = scmp.lt.s32.totalorder %s1141_s30, %s1135_s28 }
  0x6d   : > { %868 = vmatprep.subr.bf16.mxu0 %v1215_v0  ;;  %888 = vmatprep.subr.bf16.mxu1 %v1215_v0  ;;  %v806_v25 = vld [vmem:[%s1495_s2] ss:$0 sm:$0xff]  ;;  %v1027_v33 = vld [vmem:[#allocation8 + $0x8] sm:$0xff]   ;;  %v1028_v34 = vld [vmem:[#allocation8] sm:$0xff]   ;;  %p1138_p0 = pneg %p1137_p12 }
  0x6e   : > { %v815_v35 = vld [vmem:[%s1497_s4] ss:$0 sm:$0xff]  ;;  %p1144_p7 = por %p1143_p3, %p1142_p5 }
  0x6f   : > { %v824_v43 = vld [vmem:[%s1499_s6] ss:$0 sm:$0xff] }
  0x70   : > { %869 = vmatpush3.bf16.msra.mxu0 %v1007_v3  ;;  %889 = vmatpush3.bf16.msra.mxu1 %v1015_v8  ;;  %p1145_p9 = pnand %p1144_p7, %p1138_p0 }
  0x71   : > { %870 = vmatprep.subr.bf16.mxu0 %v1215_v0  ;;  %890 = vmatprep.subr.bf16.mxu1 %v1215_v0 }
  0x74   : > { %871 = vmatpush3.bf16.msra.mxu0 %v1008_v5  ;;  %891 = vmatpush3.bf16.msra.mxu1 %v1016_v10 }
  0x75   : > { %872 = vmatprep.subr.bf16.mxu0 %v1215_v0  ;;  %892 = vmatprep.subr.bf16.mxu1 %v1215_v0 }
  0x78   : > { %873 = vmatpush3.bf16.msra.mxu0 %v1009_v7  ;;  %893 = vmatpush3.bf16.msra.mxu1 %v1017_v12 }
  0x79   : > { %874 = vmatprep.subr.bf16.mxu0 %v1215_v0  ;;  %894 = vmatprep.subr.bf16.mxu1 %v1215_v0 }
  0x7c   : > { %875 = vmatpush3.bf16.msra.mxu0 %v1010_v9  ;;  %895 = vmatpush3.bf16.msra.mxu1 %v1018_v15 }
  0x7d   : > { %876 = vmatprep.subr.bf16.mxu0 %v1215_v0  ;;  %896 = vmatprep.subr.bf16.mxu1 %v1215_v0 }
  0x80   : > { %877 = vmatpush3.bf16.msra.mxu0 %v1011_v11  ;;  %897 = vmatpush3.bf16.msra.mxu1 %v1019_v17 }
  0x81   : > { %878 = vmatprep.subr.bf16.mxu0 %v1215_v0  ;;  %898 = vmatprep.subr.bf16.mxu1 %v1215_v0 }
  0x84   : > { %879 = vmatpush3.bf16.msra.mxu0 %v1012_v13  ;;  %899 = vmatpush3.bf16.msra.mxu1 %v1020_v18 }
  0x85   : > { %904 = vmatprep.subr.bf16.mxu0 %v1215_v0 }
  0x87   : > { %881 = vmatmul.mubr.bf16.vlgmr.msra.gmra.mxu0 %v357_v16 }
  0x88   : > { %920 = vmatprep.mubr.msk.bf16.mxu0 %vm1216_vm0, %v1215_v0  ;;  %905 = vmatpush3.bf16.msra.mxu0 %v1021_v19 }
  0x89   : > { %906 = vmatprep.subr.bf16.mxu0 %v1215_v0 }
  0x8c   : > { %907 = vmatpush3.bf16.msra.mxu0 %v1022_v20 }
  0x8d   : > { %908 = vmatprep.subr.bf16.mxu0 %v1215_v0 }
  0x90   : > { %909 = vmatpush3.bf16.msra.mxu0 %v1023_v21 }
  0x91   : > { %910 = vmatprep.subr.bf16.mxu0 %v1215_v0 }
  0x94   : > { %911 = vmatpush3.bf16.msra.mxu0 %v1024_v22 }
  0x95   : > { %912 = vmatprep.subr.bf16.mxu0 %v1215_v0 }
  0x98   : > { %913 = vmatpush3.bf16.msra.mxu0 %v1025_v23 }
  0x99   : > { %914 = vmatprep.subr.bf16.mxu0 %v1215_v0 }
  0x9c   : > { %915 = vmatpush3.bf16.msra.mxu0 %v1026_v24 }
  0x9d   : > { %916 = vmatprep.subr.bf16.mxu0 %v1215_v0 }
  0xa0   : > { %917 = vmatpush3.bf16.msra.mxu0 %v1027_v33 }
  0xa1   : > { %918 = vmatprep.subr.bf16.mxu0 %v1215_v0 }
  0xa4   : > { %919 = vmatpush3.bf16.msra.mxu0 %v1028_v34 }
 0x147   : > { %v446_v26 = vpop.f32.mrf.mxu0 }
 0x148   : > { %v447_v27 = vadd.f32 %v806_v25, %v446_v26 }
 0x149   : > { %v882_v28 = vpop.f32.mrf.mxu0 }
 0x14a   : > { %v452_v29 = vmax.f32 %v447_v27, 0.0 }
 0x14b   : > { %v449_v30 = vpop.f32.mrf.mxu0 }
 0x14c   : > { %v470_v31 = vpack.c.bf16 %v452_v29, %v452_v29 }
 0x14d   : > { %v883_v32 = vpop.f32.mrf.mxu0 }
 0x14e   : > { %901 = vmatmul.mubr.bf16.vlgmr.msra.gmra.mxu1 %v470_v31 }
 0x20e   : > { %v559_v36 = vpop.f32.mrf.mxu1 }
 0x20f   : > { %v560_v37 = vadd.f32 %v815_v35, %v559_v36 }
 0x210   : > { %v902_v38 = vpop.f32.mrf.mxu1 }
 0x211   : > { %v565_v39 = vmax.f32 %v560_v37, 0.0 }
 0x212   : > { %v562_v40 = vpop.f32.mrf.mxu1 }
 0x213   : > { %v583_v41 = vpack.c.bf16 %v565_v39, %v565_v39 }
 0x214   : > { %v903_v42 = vpop.f32.mrf.mxu1 }
 0x215   : > { %921 = vmatmul.mubr.bf16.vlgmr.msra.gmra.mxu0 %v583_v41 }
 0x2d5   : > { %v672_v44 = vpop.f32.mrf.mxu0 }
 0x2d6   : > { %v673_v45 = vadd.f32 %v824_v43, %v672_v44 }
 0x2d7   : > { %v922_v46 = vpop.f32.mrf.mxu0 }
 0x2d8   : > { %678 = vst [vmem:[%s337_s18] sm:$0xff] %v673_v45 }
 0x2d9   : > { %v675_v47 = vpop.f32.mrf.mxu0 }
 0x2da   : > { %1148 = shalt.err (!%p1145_p9)
}
 0x2db   : > { %s1149_s9 = scalar_lea.hbm %s1450_s21, 128  ;;  %s1153_s10 = scalar_lea.hbm %s1500_s7, 256 }
 0x2dc   : > { %p1150_p13 = scmp.ne.s32.totalorder %s1450_s21, %s1149_s9  ;;  %p1154_p11 = scmp.lt.s32.totalorder %s1450_s21, %s1500_s7 }
 0x2dd   : > { %p1155_p1 = scmp.lt.s32.totalorder %s1153_s10, %s1149_s9 }
 0x2de   : > { %p1151_p8 = pnand %p1150_p13, %p1522_p6 }
 0x2df   : > { %p1156_p2 = por %p1155_p1, %p1154_p11 }
 0x2e0   : > { %p1152_p10 = pneg %p1151_p8 }
 0x2e2   : > { %p1157_p4 = pnand %p1156_p2, %p1152_p10 }
 0x2e4   : > { %1160 = shalt.err (!%p1157_p4)
}
 0x2e5   : > { %938 = dma.vmem_to_hbm [thread:$0]  (%p1522_p6), %s1452_s19, 128, %s1450_s21, %s680_s1   ;;  %v923_v48 = vpop.f32.mrf.mxu0 }
 0x2e6 PF: > { %s705_s22 = sand.u32 1, %s1195_s24   ;;  %p1523_p12 = scmp.ne.s32.totalorder %s1508_s8, 0 }
 0x2e7   : > { %p1524_p0 = scmp.ge.s32.totalorder %s1207_s27, 2  ;;  %s706_s18 = scalar_lea.sflag [#allocation4], %s705_s22 }
 0x2e9   : > { %p955_p5 = pnand %p1524_p0, %p1523_p12 }
 0x2eb   : > { %p956_p3 = pneg %p955_p5 }
 0x2ed   : > { %1190 = dma.done.wait (%p956_p3), %s706_s18, 128  }
 0x2ee   : > { %1192 = vsyncadd (%p956_p3), %s706_s18, 4294967168  ;;  %p22_p7 = scmp.ge.s32.totalorder %s1338_s14, 4   ;;  %s1525_s24 = smov %s1199_s25 }
 0x2ef   : > { %s1526_s25 = smov %s1203_s26  ;;  %s1527_s26 = smov %s1348_s17 }
 0x2f0   : > { %s1528_s27 = smov %s1338_s14  ;;  %24 = sbr.rel (!%p22_p7) target bundleno = 10 (0xa), region = 105 }
 0x2f5   :  { %711 = vsyncpa [#allocation3], 1 }
 0x2f6   :  { %713 = vsyncpa [#allocation3 + $0x1], 1 }
 0x2f7   :  { %714 = vsyncpa [#allocation6], 1 }
 0x2f8   :  { %715 = vsyncpa [#allocation9], 1 }
 0x2f9   :  { %716 = vsyncpa [#allocation4], 1 }
 0x2fa   :  { %718 = vsyncpa [#allocation4 + $0x1], 1 }

</bundles_post_ra>
